<compile_context>
chip_gen: v5e
topology: v5e:2x2
jax: 0.10.0
libtpu: 0.0.40
codegen_flags: <defaults>
</compile_context>

<pallas_src>
import functools

import jax
import jax.numpy as jnp
from jax.experimental import pallas as pl
from jax.experimental.pallas import tpu as pltpu


IN_FEATURES = 784
OUT_FEATURES = 10

# Lane-dense padded output width (multiple of 128) — pads only the tiny weight,
# bias and output arrays, never the batch-sized x.
N_PAD = 128


def linear_kernel(x_ref, w_ref, b_ref, o_ref):
    # x tile arrives as f32 (no wrapper pad/cast); cast to bf16 on the VPU —
    # completely hidden under the x DMA for this bandwidth-bound layer.
    x_bf = x_ref[...].astype(jnp.bfloat16)
    acc = jnp.dot(x_bf, w_ref[...], preferred_element_type=jnp.float32)
    o_ref[...] = (acc + b_ref[...]).astype(o_ref.dtype)


def _round_up(x, m):
    return (x + m - 1) // m * m


@functools.partial(jax.jit)
def linear_pallas(x, w, b):
    """y = x @ w + b   (forward of nn.Linear(784, 10))

    x: (B, 784) f32
    w: (784, 10) f32   (nn.Linear weight transposed to (in, out))
    b: (10,) or (1, 10) f32
    returns (B, 10) f32
    """
    B, K = x.shape
    Kw, N = w.shape
    assert K == Kw == IN_FEATURES and N == OUT_FEATURES
    b = b.reshape(1, N)

    # Only the small, batch-independent arrays get padded / cast.
    w_p = jnp.pad(w, ((0, 0), (0, N_PAD - N))).astype(jnp.bfloat16)
    b_p = jnp.pad(b, ((0, 0), (0, N_PAD - N)))  # f32 bias

    # Batch tiling:
    #  * B <= 8: single full-extent block (legal: block dim == array dim).
    #  * otherwise: multiple of 8, capped at 1024, and sized so the grid has
    #    at least 2 steps (keeps both v7x TensorCores busy for mid-size B).
    if B <= 8:
        tile_m = B
    else:
        tile_m = min(1024, _round_up(pl.cdiv(B, 2), 8))
    grid_m = pl.cdiv(B, tile_m)  # ragged last block handled by Pallas

    # Honest, advisory cost model: this op is HBM-bound (AI ~5 FLOP/byte).
    cost = pl.CostEstimate(
        flops=2 * B * K * N,
        transcendentals=0,
        bytes_accessed=(B * K * 4            # x read (f32)
                        + K * N_PAD * 2      # w read (bf16)
                        + N_PAD * 4          # b read
                        + B * N_PAD * 2),    # padded bf16 output write
    )

    y_p = pl.pallas_call(
        linear_kernel,
        out_shape=jax.ShapeDtypeStruct((B, N_PAD), jnp.bfloat16),
        grid=(grid_m,),
        in_specs=[
            pl.BlockSpec((tile_m, K), lambda i: (i, 0)),     # x tile, f32
            pl.BlockSpec((K, N_PAD), lambda i: (0, 0)),      # w, resident bf16
            pl.BlockSpec((1, N_PAD), lambda i: (0, 0)),      # b, resident f32
        ],
        out_specs=pl.BlockSpec((tile_m, N_PAD), lambda i: (i, 0)),
        compiler_params=pltpu.CompilerParams(
            dimension_semantics=("parallel",),
        ),
        cost_estimate=cost,
    )(x, w_p, b_p)

    # Slice the 10 real logit columns back off and restore f32.
    return y_p[:, :N].astype(jnp.float32)


def net_forward(x, w, b, *, min_pallas_batch=256):
    """Dispatcher: at tiny batch sizes the pallas_call launch + pad/slice ops
    dominate the ~125 KFLOP of useful work, so use plain XLA there."""
    if x.shape[0] < min_pallas_batch:
        return x @ w + b.reshape(1, -1)
    return linear_pallas(x, w, b)


if __name__ == "__main__":
    key = jax.random.PRNGKey(0)
    kx, kw, kb = jax.random.split(key, 3)

    # Small batch; deliberately not a multiple of the tile size so the ragged
    # last grid block (padded reads / masked writes) is exercised.
    B = 13
    x = jax.random.normal(kx, (B, IN_FEATURES), dtype=jnp.float32)
    # PyTorch stores weight as (out_features, in_features); keep it transposed
    # as (in_features, out_features) for the kernel.
    w = jax.random.normal(kw, (IN_FEATURES, OUT_FEATURES), dtype=jnp.float32) * 0.02
    b = jax.random.normal(kb, (OUT_FEATURES,), dtype=jnp.float32) * 0.02

    y = linear_pallas(x, w, b)
    jax.block_until_ready(y)

    # Tight reference: same bf16 inputs, f32 accumulation, f32 bias.
    y_ref_bf16 = (x.astype(jnp.bfloat16).astype(jnp.float32)
                  @ w.astype(jnp.bfloat16).astype(jnp.float32)) + b
    # Loose reference: full-f32 nn.Linear (bf16 rounding over K=784 + bf16 store).
    y_ref_f32 = x @ w + b

    assert y.shape == (B, OUT_FEATURES)
    assert y.dtype == jnp.float32
    assert jnp.allclose(y, y_ref_bf16, atol=2e-2, rtol=2e-2)
    assert jnp.allclose(y, y_ref_f32, atol=5e-2, rtol=5e-2)

    print("KERNEL_OK")
</pallas_src>

<mosaic_0001>
module attributes {stable_mosaic.version = 11 : i64} {
  func.func @linear_kernel(%arg0: i32, %arg1: memref<8x784xf32, #tpu.memory_space<vmem>>, %arg2: memref<784x128xbf16, #tpu.memory_space<vmem>>, %arg3: memref<1x128xf32, #tpu.memory_space<vmem>>, %arg4: memref<8x128xbf16, #tpu.memory_space<vmem>>) attributes {dimension_semantics = [#tpu.dimension_semantics<parallel>], iteration_bounds = array<i64: 2>, scalar_prefetch = 0 : i64, scratch_operands = 0 : i64, tpu.core_type = #tpu.core_type<tc>, window_params = [{transform_indices = @transform_0, window_bounds = array<i64: 8, 784>}, {pipeline_mode = #tpu.pipeline_mode<synchronous>, transform_indices = @transform_1, window_bounds = array<i64: 784, 128>}, {pipeline_mode = #tpu.pipeline_mode<synchronous>, transform_indices = @transform_2, window_bounds = array<i64: 1, 128>}, {transform_indices = @transform_3, window_bounds = array<i64: 8, 128>}]} {
    %c0 = arith.constant 0 : index
    %c0_0 = arith.constant 0 : index
    %0 = vector.load %arg1[%c0, %c0_0] : memref<8x784xf32, #tpu.memory_space<vmem>>, vector<8x784xf32>
    %1 = arith.truncf %0 : vector<8x784xf32> to vector<8x784xbf16>
    %c0_1 = arith.constant 0 : index
    %c0_2 = arith.constant 0 : index
    %2 = vector.load %arg2[%c0_1, %c0_2] : memref<784x128xbf16, #tpu.memory_space<vmem>>, vector<784x128xbf16>
    %cst = arith.constant dense<0.000000e+00> : vector<8x128xf32>
    %3 = tpu.matmul %1, %2, %cst {dimension_numbers = #tpu.dot_dimension_numbers<[1], [0], [0], [1], [0, 0, 1, 1], [], []>} : vector<8x784xbf16>, vector<784x128xbf16>, vector<8x128xf32> -> vector<8x128xf32>
    %c0_3 = arith.constant 0 : index
    %c0_4 = arith.constant 0 : index
    %4 = vector.load %arg3[%c0_3, %c0_4] : memref<1x128xf32, #tpu.memory_space<vmem>>, vector<1x128xf32>
    %5 = vector.broadcast %4 : vector<1x128xf32> to vector<8x128xf32>
    %6 = arith.addf %3, %5 : vector<8x128xf32>
    %7 = arith.truncf %6 : vector<8x128xf32> to vector<8x128xbf16>
    %c0_5 = arith.constant 0 : index
    %c0_6 = arith.constant 0 : index
    %8 = vector.load %arg4[%c0_5, %c0_6] : memref<8x128xbf16, #tpu.memory_space<vmem>>, vector<8x128xbf16>
    tpu.vector_store %arg4[%c0_5, %c0_6], %7 {strides = array<i32>} : memref<8x128xbf16, #tpu.memory_space<vmem>>, vector<8x128xbf16>,
    return
  }
  func.func @transform_0(%arg0: i32) -> (i32, i32) {
    %c0_i32 = arith.constant 0 : i32
    %c0_i32_0 = arith.constant 0 : i32
    return %arg0, %c0_i32 : i32, i32
  }
  func.func @transform_1(%arg0: i32) -> (i32, i32) {
    %c0_i32 = arith.constant 0 : i32
    %c0_i32_0 = arith.constant 0 : i32
    %c0_i32_1 = arith.constant 0 : i32
    return %c0_i32, %c0_i32_0 : i32, i32
  }
  func.func @transform_2(%arg0: i32) -> (i32, i32) {
    %c0_i32 = arith.constant 0 : i32
    %c0_i32_0 = arith.constant 0 : i32
    %c0_i32_1 = arith.constant 0 : i32
    return %c0_i32, %c0_i32_0 : i32, i32
  }
  func.func @transform_3(%arg0: i32) -> (i32, i32) {
    %c0_i32 = arith.constant 0 : i32
    %c0_i32_0 = arith.constant 0 : i32
    return %arg0, %c0_i32 : i32, i32
  }
}

</mosaic_0001>

<bundles_post_ra>
// kernel: linear_pallas.1
= control target key start
LH: loop header
LB: loop body
LE: loop exit
PB: predicated region body
PF: predicated region fallthrough
CT: control target
= control target key end

     0   :  { %s1023_s12 = smov 0   ;;  %s1207_s0 = inlined_call_operand.vmem [shape: f32[13,784], index: 0, kind: input, shape index: {}]   ;;  %s1208_s1 = inlined_call_operand.vmem [shape: bf16[784,128], index: 1, kind: input, shape index: {}]   ;;  %s1209_s2 = inlined_call_operand.vmem [shape: f32[1,128], index: 2, kind: input, shape index: {}]   ;;  %s1210_s3 = inlined_call_operand.vmem [shape: bf16[13,128], index: 3, kind: output, shape index: {}]  }
   0x1 LB: > { %s730_s13 = sadd.s32 4294967295, %s1001_s12   ;;  %p734_p0 = scmp.ge.s32.totalorder %s1001_s12, 1  ;;  %s1001_s12 = sphi %s1023_s12, %s13_s12  }
   0x2   : > { %p137_p1 = scmp.lt.s32.totalorder %s1001_s12, 3 }
   0x4   : > { %p138_p2 = pnand %p734_p0, %p137_p1 }
   0x5   : > { %p160_p3 = scmp.lt.s32.totalorder (!%p138_p2), %s730_s13, 1 }
   0x6   : > { %141 = sbr.rel (%p138_p2) target bundleno = 210 (0xd2), region = 32 }
   0xb   : > { %v943_v0 = vld [vmem:[%s1208_s1 + $0x38] sm:$0xff]  ;;  %v942_v3 = vld [vmem:[%s1208_s1 + $0x30] sm:$0xff]  ;;  %v941_v8 = vld [vmem:[%s1208_s1 + $0x28] sm:$0xff]  ;;  %s1212_s13 = smov (!%p160_p3, %s730_s13), 1  ;;  %vm580_vm0 = vcmask 130048  }
   0xc   : > { %v951_v1 = vld [vmem:[%s1208_s1 + $0x78] sm:$0xff]  ;;  %584 = vmatpush.bf16.msra.mxu0 %v943_v0  ;;  %v950_v4 = vld [vmem:[%s1208_s1 + $0x70] sm:$0xff]  ;;  %v949_v9 = vld [vmem:[%s1208_s1 + $0x68] sm:$0xff]  ;;  %s985_s8 = smul.u32 56, %s1212_s13 }
   0xd   : > { %v959_v2 = vld [vmem:[%s1208_s1 + $0xb8] sm:$0xff]  ;;  %597 = vmatpush.bf16.msra.mxu1 %v951_v1  ;;  %v958_v5 = vld [vmem:[%s1208_s1 + $0xb0] sm:$0xff]  ;;  %v957_v10 = vld [vmem:[%s1208_s1 + $0xa8] sm:$0xff] }
   0xe   : > { %610 = vmatpush.bf16.msra.mxu2 %v959_v2  ;;  %v967_v6 = vld [vmem:[%s1208_s1 + $0xf8] sm:$0xff]  ;;  %v966_v7 = vld [vmem:[%s1208_s1 + $0xf0] sm:$0xff]  ;;  %v965_v11 = vld [vmem:[%s1208_s1 + $0xe8] sm:$0xff]  ;;  %s1122_s21 = scalar_lea.vmem %s1207_s0, %s985_s8 }
   0xf   : > { %623 = vmatpush.bf16.msra.mxu3 %v967_v6  ;;  %v940_v12 = vld [vmem:[%s1208_s1 + $0x20] sm:$0xff]  ;;  %v939_v16 = vld [vmem:[%s1208_s1 + $0x18] sm:$0xff]  ;;  %v938_v20 = vld [vmem:[%s1208_s1 + $0x10] sm:$0xff] }
  0x10   : > { %585 = vmatpush.bf16.msra.mxu0 %v942_v3  ;;  %v948_v13 = vld [vmem:[%s1208_s1 + $0x60] sm:$0xff]  ;;  %v947_v17 = vld [vmem:[%s1208_s1 + $0x58] sm:$0xff]  ;;  %v946_v21 = vld [vmem:[%s1208_s1 + $0x50] sm:$0xff] }
  0x11   : > { %598 = vmatpush.bf16.msra.mxu1 %v950_v4  ;;  %v956_v14 = vld [vmem:[%s1208_s1 + $0xa0] sm:$0xff]  ;;  %v955_v18 = vld [vmem:[%s1208_s1 + $0x98] sm:$0xff]  ;;  %v954_v22 = vld [vmem:[%s1208_s1 + $0x90] sm:$0xff] }
  0x12   : > { %611 = vmatpush.bf16.msra.mxu2 %v958_v5  ;;  %v964_v15 = vld [vmem:[%s1208_s1 + $0xe0] sm:$0xff]  ;;  %v963_v19 = vld [vmem:[%s1208_s1 + $0xd8] sm:$0xff]  ;;  %v962_v23 = vld [vmem:[%s1208_s1 + $0xd0] sm:$0xff] }
  0x13   : > { %624 = vmatpush.bf16.msra.mxu3 %v966_v7  ;;  %v937_v24 = vld [vmem:[%s1208_s1 + $0x8] sm:$0xff]  ;;  %v936_v27 = vld [vmem:[%s1208_s1] sm:$0xff]  ;;  %v975_v33 = vld [vmem:[%s1208_s1 + $0x138] sm:$0xff] }
  0x14   : > { %586 = vmatpush.bf16.msra.mxu0 %v941_v8  ;;  %v945_v25 = vld [vmem:[%s1208_s1 + $0x48] sm:$0xff]  ;;  %v944_v29 = vld [vmem:[%s1208_s1 + $0x40] sm:$0xff]  ;;  %v172_v34 = vld [vmem:[%s1122_s21 + $0x10] sm:$0xff] }
  0x15   : > { %599 = vmatpush.bf16.msra.mxu1 %v949_v9  ;;  %v953_v26 = vld [vmem:[%s1208_s1 + $0x88] sm:$0xff]  ;;  %v170_v30 = vld [vmem:[%s1122_s21] sm:$0xff]  ;;  %v983_v35 = vld [vmem:[%s1208_s1 + $0x178] sm:$0xff]  ;;  %v179_v39 = vpack.c.bf16 %v172_v34, %v172_v34 }
  0x16   : > { %612 = vmatpush.bf16.msra.mxu2 %v957_v10  ;;  %v961_v28 = vld [vmem:[%s1208_s1 + $0xc8] sm:$0xff]  ;;  %v952_v32 = vld [vmem:[%s1208_s1 + $0x80] sm:$0xff]  ;;  %v177_v37 = vpack.c.bf16 %v170_v30, %v170_v30  ;;  %v173_v41 = vld [vmem:[%s1122_s21 + $0x18] sm:$0xff] }
  0x17   : > { %625 = vmatpush.bf16.msra.mxu3 %v965_v11  ;;  %v171_v31 = vld [vmem:[%s1122_s21 + $0x8] sm:$0xff]  ;;  %v984_v36 = vld [vmem:[%s1208_s1 + $0x180] sm:$0xff]  ;;  %v974_v42 = vld [vmem:[%s1208_s1 + $0x130] sm:$0xff]  ;;  %v180_v44 = vpack.c.bf16 %v173_v41, %v173_v41 }
  0x18   : > { %587 = vmatpush.bf16.msra.mxu0 %v940_v12  ;;  %v178_v38 = vpack.c.bf16 %v171_v31, %v171_v31  ;;  %v960_v40 = vld [vmem:[%s1208_s1 + $0xc0] sm:$0xff]  ;;  %v982_v43 = vld [vmem:[%s1208_s1 + $0x170] sm:$0xff]  ;;  %v973_v45 = vld [vmem:[%s1208_s1 + $0x128] sm:$0xff] }
  0x19   : > { %600 = vmatpush.bf16.msra.mxu1 %v948_v13  ;;  %v981_v46 = vld [vmem:[%s1208_s1 + $0x168] sm:$0xff]  ;;  %v972_v47 = vld [vmem:[%s1208_s1 + $0x120] sm:$0xff]  ;;  %v971_v49 = vld [vmem:[%s1208_s1 + $0x118] sm:$0xff] }
  0x1a   : > { %613 = vmatpush.bf16.msra.mxu2 %v956_v14  ;;  %v980_v48 = vld [vmem:[%s1208_s1 + $0x160] sm:$0xff]  ;;  %v176_v50 = vld [vmem:[%s1122_s21 + $0x30] sm:$0xff]  ;;  %v979_v51 = vld [vmem:[%s1208_s1 + $0x158] sm:$0xff] }
  0x1b   : > { %626 = vmatpush.bf16.msra.mxu3 %v964_v15  ;;  %v183_v52 = vpack.c.bf16 %v176_v50, %v176_v50  ;;  %v970_v53 = vld [vmem:[%s1208_s1 + $0x110] sm:$0xff]  ;;  %v969_v55 = vld [vmem:[%s1208_s1 + $0x108] sm:$0xff]  ;;  %v968_v57 = vld [vmem:[%s1208_s1 + $0x100] sm:$0xff] }
  0x1c   : > { %588 = vmatpush.bf16.msra.mxu0 %v939_v16  ;;  %v978_v54 = vld [vmem:[%s1208_s1 + $0x150] sm:$0xff]  ;;  %v977_v56 = vld [vmem:[%s1208_s1 + $0x148] sm:$0xff]  ;;  %v174_v58 = vld [vmem:[%s1122_s21 + $0x20] sm:$0xff] }
  0x1d   : > { %601 = vmatpush.bf16.msra.mxu1 %v947_v17  ;;  %v976_v59 = vld [vmem:[%s1208_s1 + $0x140] sm:$0xff]  ;;  %v175_v60 = vld [vmem:[%s1122_s21 + $0x28] sm:$0xff]  ;;  %v181_v61 = vpack.c.bf16 %v174_v58, %v174_v58  ;;  %s736_s21 = sshll.u32 %s1212_s13, 2 }
  0x1e   : > { %614 = vmatpush.bf16.msra.mxu2 %v955_v18  ;;  %v182_v62 = vpack.c.bf16 %v175_v60, %v175_v60  ;;  %v994_v5 = vld [vmem:[%s1209_s2] ss:$0 sm:$0xff]  ;;  %s168_s22 = scalar_lea.vmem %s1210_s3, %s736_s21 }
  0x1f   : > { %627 = vmatpush.bf16.msra.mxu3 %v963_v19 }
  0x20   : > { %589 = vmatpush.bf16.msra.mxu0 %v938_v20 }
  0x21   : > { %602 = vmatpush.bf16.msra.mxu1 %v946_v21 }
  0x22   : > { %615 = vmatpush.bf16.msra.mxu2 %v954_v22 }
  0x23   : > { %628 = vmatpush.bf16.msra.mxu3 %v962_v23 }
  0x24   : > { %590 = vmatpush.bf16.msra.mxu0 %v937_v24 }
  0x25   : > { %603 = vmatpush.bf16.msra.mxu1 %v945_v25 }
  0x26   : > { %616 = vmatpush.bf16.msra.mxu2 %v953_v26 }
  0x27   : > { %629 = vmatpush.bf16.msra.mxu3 %v961_v28 }
  0x28   : > { %591 = vmatpush.bf16.msra.mxu0 %v936_v27 }
  0x29   : > { %604 = vmatpush.bf16.msra.mxu1 %v944_v29 }
  0x2a   : > { %617 = vmatpush.bf16.msra.mxu2 %v952_v32 }
  0x2b   : > { %592 = vmatmul.bf16.vlgmr.msra.gmra.mxu0 %v177_v37  ;;  %630 = vmatpush.bf16.msra.mxu3 %v960_v40 }
  0x2c   : > { %636 = vmatpush.bf16.msrb.mxu0 %v975_v33  ;;  %605 = vmatmul.bf16.vlgmr.msra.gmra.mxu1 %v178_v38 }
  0x2d   : > { %649 = vmatpush.bf16.msrb.mxu1 %v983_v35  ;;  %618 = vmatmul.bf16.vlgmr.msra.gmra.mxu2 %v179_v39 }
  0x2e   : > { %669 = vmatpush.bf16.msrb.mxu2 %v984_v36  ;;  %631 = vmatmul.bf16.vlgmr.msra.gmra.mxu3 %v180_v44 }
  0x30   : > { %637 = vmatpush.bf16.msrb.mxu0 %v974_v42 }
  0x31   : > { %650 = vmatpush.bf16.msrb.mxu1 %v982_v43 }
  0x34   : > { %638 = vmatpush.bf16.msrb.mxu0 %v973_v45 }
  0x35   : > { %651 = vmatpush.bf16.msrb.mxu1 %v981_v46 }
  0x38   : > { %639 = vmatpush.bf16.msrb.mxu0 %v972_v47 }
  0x39   : > { %652 = vmatpush.bf16.msrb.mxu1 %v980_v48 }
  0x3c   : > { %640 = vmatpush.bf16.msrb.mxu0 %v971_v49 }
  0x3d   : > { %653 = vmatpush.bf16.msrb.mxu1 %v979_v51  ;;  %933 = vmatmul.msk.bf16.vlgmr.msrb.gmra.mxu2 %vm580_vm0, %v183_v52 }
  0x40   : > { %641 = vmatpush.bf16.msrb.mxu0 %v970_v53 }
  0x41   : > { %654 = vmatpush.bf16.msrb.mxu1 %v978_v54 }
  0x44   : > { %642 = vmatpush.bf16.msrb.mxu0 %v969_v55 }
  0x45   : > { %655 = vmatpush.bf16.msrb.mxu1 %v977_v56 }
  0x48   : > { %643 = vmatpush.bf16.msrb.mxu0 %v968_v57 }
  0x49   : > { %656 = vmatpush.bf16.msrb.mxu1 %v976_v59 }
  0x4b   : > { %644 = vmatmul.bf16.vlgmr.msrb.gmra.mxu0 %v181_v61 }
  0x4c   : > { %657 = vmatmul.bf16.vlgmr.msrb.gmra.mxu1 %v182_v62 }
  0xa8   : > { %v593_v63 = vpop.f32.mrf.mxu0 }
  0xa9   : > { %v606_v0 = vpop.f32.mrf.mxu1  ;;  %v594_v7 = vadd.f32 %v994_v5, %v593_v63 }
  0xab   : > { %v607_v9 = vadd.f32 %v606_v0, %v594_v7 }
  0xb0   : > { %v619_v1 = vpop.f32.mrf.mxu2  ;;  %v595_v2 = vpop.f32.mrf.mxu0 }
  0xb1   : > { %v608_v3 = vpop.f32.mrf.mxu1  ;;  %v632_v4 = vpop.f32.mrf.mxu3  ;;  %v620_v11 = vadd.f32 %v619_v1, %v607_v9 }
  0xb3   : > { %v633_v12 = vadd.f32 %v632_v4, %v620_v11 }
  0xb8   : > { %v621_v6 = vpop.f32.mrf.mxu2 }
  0xb9   : > { %v634_v8 = vpop.f32.mrf.mxu3 }
  0xc0   : > { %v671_v10 = vpop.f32.mrf.mxu2 }
  0xc8   : > { %v645_v13 = vpop.f32.mrf.mxu0  ;;  %v673_v16 = vpop.f32.mrf.mxu2 }
  0xc9   : > { %v646_v14 = vadd.f32 %v645_v13, %v633_v12  ;;  %v658_v15 = vpop.f32.mrf.mxu1 }
  0xcb   : > { %v659_v17 = vadd.f32 %v658_v15, %v646_v14 }
  0xcd   : > { %v672_v18 = vadd.f32 %v671_v10, %v659_v17 }
  0xcf   : > { %v675_v19 = vpack.c.bf16 %v672_v18, %v672_v18 }
  0xd0   : > { %v647_v20 = vpop.f32.mrf.mxu0 }
  0xd1   : > { %676 = vst [vmem:[%s168_s22] sm:$0xf] %v675_v19  ;;  %v660_v21 = vpop.f32.mrf.mxu1 }
  0xd2 PF: > { %s13_s12 = sadd.s32 1, %s1001_s12  }
  0xd3   : > { %p10_p4 = scmp.ge.s32.totalorder %s13_s12, 4  }
  0xd5   :  { %12 = sbr.rel (!%p10_p4) target bundleno = 1 (0x1), region = 62 }

</bundles_post_ra>
